<compile_context>
chip_gen: v6e
topology: v6e:2x2x1
jax: 0.10.0
libtpu: 0.0.40
codegen_flags: <defaults>
</compile_context>

<pallas_src>
import functools

import jax
import jax.numpy as jnp
from jax.experimental import pallas as pl
from jax.experimental.pallas import tpu as pltpu

EPS = 1e-6


def _cdiv(a, b):
    return -(-a // b)


def _round_up(a, b):
    return _cdiv(a, b) * b


def _round_down(a, b):
    return (a // b) * b


def _layernorm_kernel(alpha_ref, bias_ref, x_ref, o_ref, *, d_model):
    # x_ref: (TR, D) tile in VMEM; alpha/bias: (1,)-shaped scalars in SMEM.
    x = x_ref[...].astype(jnp.float32)

    mean = jnp.sum(x, axis=-1, keepdims=True) * (1.0 / d_model)
    diff = x - mean

    # torch.std default is unbiased (ddof=1); eps is added to std (not var).
    # d_model == 1 -> NaN (matches torch) instead of a trace-time ZeroDivision.
    inv_dof = (1.0 / (d_model - 1)) if d_model > 1 else float("nan")
    var = jnp.sum(diff * diff, axis=-1, keepdims=True) * inv_dof
    std = jnp.sqrt(var)

    # Narrow (TR,1) reciprocal; alpha folded in => one full-width mul+add.
    # approx=False keeps numerics within the 1e-5 reference tolerance.
    scale = alpha_ref[0] * pl.reciprocal(EPS + std, approx=False)
    o_ref[...] = (diff * scale + bias_ref[0]).astype(o_ref.dtype)


def encoder_layernorm(x, alpha, bias, *, tile_rows=None):
    """LayerNorm over the last axis of x (any leading shape), matching
    Encoder.norm semantics.  No HBM padding / slicing in the wrapper."""
    orig_shape = x.shape
    D = orig_shape[-1]
    rows = 1
    for s in orig_shape[:-1]:
        rows *= s
    x2 = x.reshape(rows, D)

    itemsize = jnp.dtype(x.dtype).itemsize
    # Sublane packing granularity for the row axis (8 for f32, 16 for bf16).
    row_align = max(8, 32 // itemsize)

    if tile_rows is None:
        # Effective VMEM footprint per row: double-buffered input + output
        # blocks (4 * D * itemsize) plus the f32 temporaries the compiler
        # materializes in the kernel (x_f32, diff, diff*diff ~ 3 * D * 4).
        per_row = 4 * D * itemsize + 3 * D * 4
        budget = 16 * 1024 * 1024  # effective footprint target (all gens)
        tile_rows = min(4096, max(row_align, budget // per_row))

    # Keep at least two grid steps whenever there are enough aligned rows so
    # the "parallel" row axis can actually shard across v7x's 2 TensorCores
    # (harmless no-op on single-TC v5e/v6e).
    rows_aligned = _round_up(rows, row_align)
    if rows_aligned >= 2 * row_align:
        tile_rows = min(tile_rows, _round_down(rows_aligned // 2, row_align))
    tile_rows = max(row_align, _round_down(tile_rows, row_align))

    if tile_rows >= rows:
        # Single block equal to the full row extent: no alignment constraint,
        # no out-of-bounds region at all.
        tile_rows = rows
        grid_n = 1
    else:
        # Balance block sizes so the final (partially out-of-bounds) block
        # wastes as little traffic as possible.  Pallas masks OOB reads/writes
        # of the last block; rows are independent so garbage rows are dropped.
        grid_n = _cdiv(rows, tile_rows)
        tile_rows = _round_up(_cdiv(rows, grid_n), row_align)
        grid_n = _cdiv(rows, tile_rows)

    kernel = functools.partial(_layernorm_kernel, d_model=D)

    out2 = pl.pallas_call(
        kernel,
        out_shape=jax.ShapeDtypeStruct((rows, D), x.dtype),
        grid=(grid_n,),
        in_specs=[
            pl.BlockSpec(memory_space=pltpu.MemorySpace.SMEM),  # alpha
            pl.BlockSpec(memory_space=pltpu.MemorySpace.SMEM),  # bias
            pl.BlockSpec((tile_rows, D), lambda i: (i, 0)),
        ],
        out_specs=pl.BlockSpec((tile_rows, D), lambda i: (i, 0)),
        compiler_params=pltpu.CompilerParams(
            dimension_semantics=("parallel",),
            vmem_limit_bytes=32 * 1024 * 1024,  # 2x headroom over the budget
        ),
        cost_estimate=pl.CostEstimate(
            flops=7 * rows * D,
            transcendentals=2 * rows,
            bytes_accessed=2 * rows * D * itemsize,
        ),
    )(alpha, bias, x2)

    return out2.reshape(orig_shape)


def encoder_forward(x, src_mask, layers, alpha, bias):
    # TODO(synk): `layers` are defined outside this module; applied as-is
    # (identity stack here) before the Pallas LayerNorm.
    for layer in layers:
        x = layer(x, src_mask)
    return encoder_layernorm(x, alpha, bias)


def _reference_layernorm(x, alpha, bias):
    xf = x.astype(jnp.float32)
    mean = jnp.mean(xf, axis=-1, keepdims=True)
    std = jnp.std(xf, axis=-1, keepdims=True, ddof=1)
    return (alpha * (xf - mean) / (EPS + std) + bias).astype(x.dtype)


if __name__ == "__main__":
    key = jax.random.PRNGKey(0)
    B, S, D = 2, 8, 32
    k1, k2 = jax.random.split(key)

    x = jax.random.normal(k1, (B, S, D), dtype=jnp.float32)
    src_mask = jnp.ones((B, 1, S, S), dtype=jnp.float32)  # unused by identity layers

    # Deterministic parameter init matching nn.Parameter(torch.ones(1)) /
    # torch.zeros(1) in the module's __init__.
    alpha = jnp.ones((1,), dtype=jnp.float32)
    bias = jnp.zeros((1,), dtype=jnp.float32)

    layers = []  # no concrete layer definition supplied by the module
    out = encoder_forward(x, src_mask, layers, alpha, bias)
    out = jax.block_until_ready(out)

    ref = _reference_layernorm(x, alpha[0], bias[0])
    assert out.shape == (B, S, D)
    assert jnp.allclose(out, ref, atol=1e-5, rtol=1e-5), "mismatch vs reference"

    # Unaligned row count exercises the masked, partially out-of-bounds final
    # block (no wrapper-side padding involved).
    x_odd = jax.random.normal(k2, (3, 5, D), dtype=jnp.float32)
    out_odd = jax.block_until_ready(encoder_layernorm(x_odd, alpha, bias))
    ref_odd = _reference_layernorm(x_odd, alpha[0], bias[0])
    assert out_odd.shape == (3, 5, D)
    assert jnp.allclose(out_odd, ref_odd, atol=1e-5, rtol=1e-5), "mismatch (odd rows)"

    print("KERNEL_OK")
</pallas_src>

<mosaic_0001>
module attributes {stable_mosaic.version = 11 : i64} {
  func.func @_layernorm_kernel(%arg0: i32, %arg1: memref<1xf32, #tpu.memory_space<smem>>, %arg2: memref<1xf32, #tpu.memory_space<smem>>, %arg3: memref<8x32xf32, #tpu.memory_space<vmem>>, %arg4: memref<8x32xf32, #tpu.memory_space<vmem>>) attributes {dimension_semantics = [#tpu.dimension_semantics<parallel>], iteration_bounds = array<i64: 2>, scalar_prefetch = 0 : i64, scratch_operands = 0 : i64, tpu.core_type = #tpu.core_type<tc>, window_params = [{transform_indices = @transform_0, window_bounds = array<i64: 1>}, {transform_indices = @transform_1, window_bounds = array<i64: 1>}, {transform_indices = @transform_2, window_bounds = array<i64: 8, 32>}, {transform_indices = @transform_3, window_bounds = array<i64: 8, 32>}]} {
    %c0 = arith.constant 0 : index
    %c0_0 = arith.constant 0 : index
    %0 = vector.load %arg3[%c0, %c0_0] : memref<8x32xf32, #tpu.memory_space<vmem>>, vector<8x32xf32>
    %cst = arith.constant dense<0.000000e+00> : vector<8xf32>
    %1 = vector.multi_reduction <add>, %0, %cst [1] : vector<8x32xf32> to vector<8xf32>
    %2 = vector.shape_cast %1 : vector<8xf32> to vector<8x1xf32>
    %cst_1 = arith.constant 3.125000e-02 : f32
    %3 = vector.broadcast %cst_1 : f32 to vector<8x1xf32>
    %4 = arith.mulf %2, %3 : vector<8x1xf32>
    %5 = vector.broadcast %4 : vector<8x1xf32> to vector<8x32xf32>
    %6 = arith.subf %0, %5 : vector<8x32xf32>
    %7 = arith.mulf %6, %6 : vector<8x32xf32>
    %cst_2 = arith.constant dense<0.000000e+00> : vector<8xf32>
    %8 = vector.multi_reduction <add>, %7, %cst_2 [1] : vector<8x32xf32> to vector<8xf32>
    %9 = vector.shape_cast %8 : vector<8xf32> to vector<8x1xf32>
    %cst_3 = arith.constant 0.0322580636 : f32
    %10 = vector.broadcast %cst_3 : f32 to vector<8x1xf32>
    %11 = arith.mulf %9, %10 : vector<8x1xf32>
    %12 = math.sqrt %11 : vector<8x1xf32>
    %c0_4 = arith.constant 0 : index
    %13 = memref.load %arg1[%c0_4] : memref<1xf32, #tpu.memory_space<smem>>
    %cst_5 = arith.constant 9.99999997E-7 : f32
    %14 = vector.broadcast %cst_5 : f32 to vector<8x1xf32>
    %15 = arith.addf %14, %12 : vector<8x1xf32>
    %16 = tpu.reciprocal %15 : vector<8x1xf32> -> vector<8x1xf32>
    %17 = vector.broadcast %13 : f32 to vector<8x1xf32>
    %18 = arith.mulf %17, %16 : vector<8x1xf32>
    %19 = vector.broadcast %18 : vector<8x1xf32> to vector<8x32xf32>
    %20 = arith.mulf %6, %19 : vector<8x32xf32>
    %c0_6 = arith.constant 0 : index
    %21 = memref.load %arg2[%c0_6] : memref<1xf32, #tpu.memory_space<smem>>
    %22 = vector.broadcast %21 : f32 to vector<8x32xf32>
    %23 = arith.addf %20, %22 : vector<8x32xf32>
    %c0_7 = arith.constant 0 : index
    %c0_8 = arith.constant 0 : index
    %24 = vector.load %arg4[%c0_7, %c0_8] : memref<8x32xf32, #tpu.memory_space<vmem>>, vector<8x32xf32>
    tpu.vector_store %arg4[%c0_7, %c0_8], %23 {strides = array<i32>} : memref<8x32xf32, #tpu.memory_space<vmem>>, vector<8x32xf32>,
    return
  }
  func.func @transform_0(%arg0: i32) -> i32 {
    %c0_i32 = arith.constant 0 : i32
    %c0_i32_0 = arith.constant 0 : i32
    return %c0_i32 : i32
  }
  func.func @transform_1(%arg0: i32) -> i32 {
    %c0_i32 = arith.constant 0 : i32
    %c0_i32_0 = arith.constant 0 : i32
    return %c0_i32 : i32
  }
  func.func @transform_2(%arg0: i32) -> (i32, i32) {
    %c0_i32 = arith.constant 0 : i32
    %c0_i32_0 = arith.constant 0 : i32
    return %arg0, %c0_i32 : i32, i32
  }
  func.func @transform_3(%arg0: i32) -> (i32, i32) {
    %c0_i32 = arith.constant 0 : i32
    %c0_i32_0 = arith.constant 0 : i32
    return %arg0, %c0_i32 : i32, i32
  }
}

</mosaic_0001>

<bundles_post_ra>
// kernel: tpu_custom_call.1
= control target key start
LH: loop header
LB: loop body
LE: loop exit
PB: predicated region body
PF: predicated region fallthrough
CT: control target
= control target key end

     0   :  { %s633_s0 = inlined_call_operand.<no memory space> [shape: f32[1], index: 0, kind: input, shape index: {}]   ;;  %s634_s1 = inlined_call_operand.<no memory space> [shape: f32[1], index: 1, kind: input, shape index: {}]   ;;  %s635_s2 = inlined_call_operand.hbm [shape: f32[16,32], index: 2, kind: input, shape index: {}]   ;;  %s636_s3 = inlined_call_operand.hbm [shape: f32[16,32], index: 3, kind: output, shape index: {}]  }
   0x1   :  { %8 = sst [smem:[#allocation2]] %s633_s0 }
   0x2   :  { %9 = sst [smem:[#allocation3]] %s634_s1 }
   0x3   :  { %10 = vsyncpa [#allocation5], 0 }
   0x4   :  { %12 = vsyncpa [#allocation5 + $0x1], 0 }
   0x5   :  { %13 = vsyncpa [#allocation6], 0 }
   0x6   :  { %15 = vsyncpa [#allocation6 + $0x1], 0  ;;  %s485_s16 = smov 0   ;;  %s487_s17 = smov 0  }
   0x7   :  { %s489_s18 = smov 0   ;;  %s491_s19 = smov 0  }
   0x8 LB: > { %s506_s0 = sadd.s32 4294967295, %s455_s19   ;;  %s301_s1 = sadd.s32 4294967294, %s455_s19   ;;  %s455_s19 = sphi %s491_s19, %s653_s19   ;;  %s451_s18 = sphi %s489_s18, %s652_s18   ;;  %s447_s17 = sphi %s487_s17, %s651_s17   ;;  %s443_s16 = sphi %s485_s16, %s650_s16  }
   0x9   : > { %s510_s20 = sadd.s32 1, %s455_s19   ;;  %s70_s21 = sadd.s32 1, %s451_s18 }
   0xa   : > { %s67_s22 = ssub.s32 %s455_s19, %s510_s20  ;;  %p77_p0 = scmp.ne.s32.totalorder %s451_s18, %s447_s17 }
   0xb   : > { %p68_p1 = scmp.eq.s32.totalorder %s67_s22, 0  ;;  %p78_p2 = scmp.eq.s32.totalorder %s455_s19, 0 }
   0xc   : > { %p83_p3 = scmp.ne.s32.totalorder %s447_s17, %s443_s16  ;;  %p84_p4 = scmp.eq.s32.totalorder %s506_s0, 0 }
   0xd   : > { %s522_s23 = scalar_select %p68_p1, %s451_s18, %s70_s21  }
   0xe   : > { %p524_p5 = por %p78_p2, %p77_p0  ;;  %p528_p6 = por %p84_p4, %p83_p3 }
   0xf   : > { %p107_p7 = scmp.eq.s32.totalorder %s506_s0, 1  ;;  %p113_p8 = scmp.eq.s32.totalorder %s301_s1, 1 }
  0x10   : > { %s640_s25 = scalar_select %p528_p6, 1, 0 }
  0x11   : > { %p325_p10 = scmp.lt.s32.totalorder %s455_s19, 2  ;;  %p535_p11 = por %p107_p7, %p77_p0 }
  0x12   : > { %p539_p12 = por %p113_p8, %p83_p3  ;;  %s139_s28 = sand.u32 1, %s451_s18  }
  0x13   : > { %s641_s26 = scalar_select %p535_p11, 1, 0 }
  0x14   : > { %s642_s27 = scalar_select %p539_p12, 1, 0 }
  0x15   : > { %s305_s29 = sshll.u32 %s455_s19, 7  ;;  %s304_s30 = sshll.u32 %s139_s28, 3 }
  0x16   : > { %s548_s6 = scalar_lea.hbm %s635_s2, %s305_s29  ;;  %s143_s7 = scalar_lea.vmem [#allocation4], %s304_s30 }
  0x17   : > { %s150_s8 = sshll.u32 %s143_s7, 4  ;;  %p552_p13 = pnand %p325_p10, %p524_p5  ;;  %s556_s8 = int_to_ptr.vmem [resolvable:$true] %s150_s8 }
  0x18   : > { %s140_s10 = scalar_lea.sflag [#allocation5], %s139_s28  ;;  %s363_s11 = scalar_lea.hbm %s548_s6, 128 }
  0x19   : > { %p364_p2 = scmp.ne.s32.totalorder %s548_s6, %s363_s11  ;;  %p365_p3 = pneg %p552_p13 }
  0x1a   : > { %s368_s14 = scalar_lea.hbm %s635_s2, 256  ;;  %p369_p5 = scmp.lt.s32.totalorder %s548_s6, %s635_s2 }
  0x1b   : > { %p366_p4 = pnand %p365_p3, %p364_p2  ;;  %p370_p8 = scmp.lt.s32.totalorder %s368_s14, %s363_s11 }
  0x1d   : > { %p367_p7 = pneg %p366_p4  ;;  %p371_p10 = por %p370_p8, %p369_p5 }
  0x1f   : > { %p372_p9 = pnand %p371_p10, %p367_p7 }
  0x21   : > { %375 = shalt.err (!%p372_p9)
}
  0x22   : > { %s376_s21 = scalar_lea.vmem %s556_s8, 128  ;;  %s457_s22 = smov [#allocation4]  }
  0x23   : > { %p377_p0 = scmp.ne.s32.totalorder %s556_s8, %s376_s21  ;;  %s381_s24 = sshll.u32 %s457_s22, 4  ;;  %s382_s24 = int_to_ptr.vmem [resolvable:$false] %s381_s24 }
  0x24   : > { %s383_s28 = scalar_lea.vmem %s382_s24, 256  ;;  %p384_p4 = scmp.lt.s32.totalorder %s556_s8, %s382_s24 }
  0x25   : > { %p379_p1 = pnand %p377_p0, %p365_p3  ;;  %p385_p12 = scmp.lt.s32.totalorder %s383_s28, %s376_s21 }
  0x27   : > { %p380_p2 = pneg %p379_p1  ;;  %p386_p11 = por %p385_p12, %p384_p4 }
  0x29   : > { %p387_p6 = pnand %p386_p11, %p380_p2 }
  0x2b   : > { %390 = shalt.err (!%p387_p6)
}
  0x2c   : > { %320 = dma.hbm_to_vmem [thread:$0]  (!%p552_p13), %s548_s6, 128, %s556_s8, %s140_s10  }
  0x2d   : > { %p644_p9 = scmp.lt.s32.totalorder %s455_s19, 3  ;;  %p645_p7 = scmp.ge.s32.totalorder %s455_s19, 1 }
  0x2f   : > { %p156_p0 = pnand %p645_p7, %p644_p9 }
  0x30   : > { %s583_s29 = sand.u32 (!%p156_p0), 1, %s447_s17   ;;  %p646_p6 = scmp.ne.s32.totalorder (!%p156_p0), %s640_s25, 0 }
  0x31   : > { %159 = sbr.rel (%p156_p0) target bundleno = 395 (0x18b), region = 32  ;;  %s307_s30 = sshll.u32 (!%p156_p0), %s583_s29, 3 }
  0x32   : > { %s162_s4 = scalar_lea.sflag (!%p156_p0), [#allocation5], %s583_s29  ;;  %s165_s5 = scalar_lea.vmem (!%p156_p0), [#allocation4], %s307_s30 }
  0x36   : > { %434 = dma.done.wait (%p646_p6), %s162_s4, 128  }
  0x37   : > { %436 = vsyncadd (%p646_p6), %s162_s4, 4294967168  ;;  %vm189_vm0 = vcmask 261120   ;;  %v188_v0 = vld [vmem:[%s165_s5] sm:$0xff]  ;;  %s207_s25 = sld [smem:[#allocation2]]  ;;  %s310_s7 = sshll.u32 %s506_s0, 7 }
  0x38   : > { %v190_v1 = vsel %vm189_vm0, %v188_v0, 0.0  ;;  %s213_s6 = sld [smem:[#allocation3]]  ;;  %s187_s8 = scalar_lea.vmem [#allocation7], %s307_s30 }
  0x39   : > { %191 = vadd.xlane.f32.xlu0 %v190_v1  ;;  %s231_s9 = sshll.u32 %s187_s8, 4  ;;  %s229_s12 = scalar_lea.hbm %s636_s3, %s310_s7  ;;  %s232_s9 = int_to_ptr.vmem [resolvable:$true] %s231_s9 }
  0x3a   : > { %s218_s13 = scalar_lea.sflag [#allocation6], %s583_s29  ;;  %s391_s14 = scalar_lea.vmem %s232_s9, 128 }
  0x3b   : > { %p392_p11 = scmp.ne.s32.totalorder %s232_s9, %s391_s14  ;;  %p647_p12 = scmp.ne.s32.totalorder %s641_s26, 0 }
  0x3c   : > { %s458_s15 = smov [#allocation7]  }
  0x3d   : > { %v210_v15 = vstv %s207_s25  ;;  %p393_p13 = pnand %p392_p11, %p647_p12  ;;  %s395_s0 = sshll.u32 %s458_s15, 4  ;;  %s396_s0 = int_to_ptr.vmem [resolvable:$false] %s395_s0 }
  0x3e   : > { %v214_v18 = vstv %s213_s6  ;;  %s397_s1 = scalar_lea.vmem %s396_s0, 256  ;;  %p398_p3 = scmp.lt.s32.totalorder %s232_s9, %s396_s0 }
  0x3f   : > { %p394_p1 = pneg %p393_p13  ;;  %p399_p5 = scmp.lt.s32.totalorder %s397_s1, %s391_s14 }
  0x41   : > { %p400_p8 = por %p399_p5, %p398_p3 }
  0x43   : > { %p401_p10 = pnand %p400_p8, %p394_p1 }
  0xc2   : > { %v192_v2 = vpop.xlane.xlu0 %191 }
  0xc3   : > { %v193_v3 = vmul.f32 0.03125, %v192_v2 }
  0xc5   : > { %v194_v4 = vsub.f32 %v188_v0, %v193_v3 }
  0xc7   : > { %v195_v5 = vmul.f32 %v194_v4, %v194_v4 }
  0xc9   : > { %v196_v6 = vsel %vm189_vm0, %v195_v5, 0.0 }
  0xca   : > { %197 = vadd.xlane.f32.xlu0 %v196_v6 }
 0x153   : > { %v198_v7 = vpop.xlane.xlu0 %197 }
 0x154   : > { %v199_v8 = vmul.f32 0.032258064, %v198_v7 }
 0x156   : > { %359 = vrsqrt.f32 %v199_v8  ;;  %vm202_vm1 = vcmp.eq.f32.partialorder %v199_v8, inf  ;;  %v205_v11 = vand.u32 2147483648, %v199_v8  ;;  %vm204_vm2 = vcmp.eq.f32.partialorder %v199_v8, 0.0 }
 0x163   : > { %v360_v9 = vpop.eup %359 }
 0x164   : > { %v201_v10 = vmul.f32 %v360_v9, %v199_v8 }
 0x166   : > { %v203_v12 = vsel %vm202_vm1, %v199_v8, %v201_v10 }
 0x167   : > { %v206_v13 = vsel %vm204_vm2, %v205_v11, %v203_v12 }
 0x168   : > { %v208_v14 = vadd.f32 1e-06, %v206_v13 }
 0x16a   : > { %361 = vrcp.f32 %v208_v14 }
 0x177   : > { %v362_v16 = vpop.eup %361 }
 0x178   : > { %v211_v17 = vmul.f32 %v362_v16, %v210_v15 }
 0x17a   : > { %v212_v19 = vmul.f32 %v211_v17, %v194_v4 }
 0x17c   : > { %v215_v20 = vadd.f32 %v214_v18, %v212_v19 }
 0x17e   : > { %216 = vst.msk [vmem:[%s187_s8] sm:$0xff] %vm189_vm0, %v215_v20 }
 0x17f   : > { %404 = shalt.err (!%p401_p10)
}
 0x180   : > { %s405_s21 = scalar_lea.hbm %s229_s12, 128  ;;  %s409_s28 = scalar_lea.hbm %s636_s3, 256 }
 0x181   : > { %p406_p2 = scmp.ne.s32.totalorder %s229_s12, %s405_s21  ;;  %p410_p7 = scmp.lt.s32.totalorder %s229_s12, %s636_s3 }
 0x182   : > { %p411_p0 = scmp.lt.s32.totalorder %s409_s28, %s405_s21 }
 0x183   : > { %p407_p4 = pnand %p406_p2, %p647_p12 }
 0x184   : > { %p412_p6 = por %p411_p0, %p410_p7 }
 0x185   : > { %p408_p9 = pneg %p407_p4 }
 0x187   : > { %p413_p11 = pnand %p412_p6, %p408_p9 }
 0x189   : > { %416 = shalt.err (!%p413_p11)
}
 0x18a   : > { %315 = dma.vmem_to_hbm [thread:$0]  (%p647_p12), %s232_s9, 128, %s229_s12, %s218_s13  }
 0x18b PF: > { %s243_s4 = sand.u32 1, %s443_s16   ;;  %p648_p13 = scmp.ne.s32.totalorder %s642_s27, 0 }
 0x18c   : > { %p649_p1 = scmp.ge.s32.totalorder %s455_s19, 2  ;;  %s244_s5 = scalar_lea.sflag [#allocation6], %s243_s4 }
 0x18e   : > { %p322_p3 = pnand %p649_p1, %p648_p13 }
 0x190   : > { %p323_p5 = pneg %p322_p3 }
 0x192   : > { %438 = dma.done.wait (%p323_p5), %s244_s5, 128  }
 0x193   : > { %440 = vsyncadd (%p323_p5), %s244_s5, 4294967168  ;;  %p18_p8 = scmp.ge.s32.totalorder %s510_s20, 4   ;;  %s650_s16 = smov %s447_s17 }
 0x194   : > { %s651_s17 = smov %s451_s18  ;;  %s652_s18 = smov %s522_s23 }
 0x195   : > { %s653_s19 = smov %s510_s20  ;;  %20 = sbr.rel (!%p18_p8) target bundleno = 8 (0x8), region = 77 }
 0x19a   :  { %249 = vsyncpa [#allocation5], 1 }
 0x19b   :  { %251 = vsyncpa [#allocation5 + $0x1], 1 }
 0x19c   :  { %252 = vsyncpa [#allocation6], 1 }
 0x19d   :  { %254 = vsyncpa [#allocation6 + $0x1], 1 }

</bundles_post_ra>
